<compile_context>
chip_gen: v5e
topology: v5e:2x2
jax: 0.10.0
libtpu: 0.0.40
codegen_flags: <defaults>
</compile_context>

<pallas_src>
import jax
import jax.numpy as jnp
from jax.experimental import pallas as pl
from jax.experimental.pallas import tpu as pltpu

_EPS = 1e-5
_VMEM_LIMIT = 32 * 1024 * 1024


# ----------------------------------------------------------------------------
# Kernel 1/2: fused [optional BN+ReLU prologue] -> 3x3 conv (single im2col
# matmul) -> bias -> border re-zero -> per-batch BN partial stats.
#
# Layout: x_ref (1, Cin, S) bf16, S = Hp*Wp flattened padded spatial (zero
# border).  Output y_ref (1, Cout, S) bf16 in the same padded layout (zero
# border), i.e. directly usable as the next conv's padded input.
# ----------------------------------------------------------------------------
def _make_conv_kernel(apply_prologue: bool, Wp: int):
    P = Wp + 1  # max |flat tap shift| = Wp + 1

    def kernel(x_ref, w_ref, b_ref, scale_ref, shift_ref, mask_ref,
               y_ref, sum_ref, sq_ref):
        Cin = x_ref.shape[1]
        S = x_ref.shape[2]
        mask = mask_ref[...]                       # (1, S) f32, 1 on interior

        xb = x_ref[0]                              # (Cin, S) bf16
        if apply_prologue:
            # BN + ReLU of the previous layer, fused into this consumer.
            xf = xb.astype(jnp.float32)
            xf = jnp.maximum(xf * scale_ref[...] + shift_ref[...], 0.0) * mask
            xb = xf.astype(jnp.bfloat16)

        # im2col: the 9 taps are constant flat shifts of the padded image.
        # Build one (9*Cin, S) operand and do a single MXU matmul (K = 9*Cin).
        z = jnp.zeros((Cin, P), jnp.bfloat16)
        xe = jnp.concatenate([z, xb, z], axis=1)   # (Cin, S + 2P)
        taps = []
        for kh in range(3):
            for kw in range(3):
                d = (kh - 1) * Wp + (kw - 1)
                taps.append(xe[:, P + d:P + d + S])
        t = jnp.concatenate(taps, axis=0)          # (9*Cin, S) bf16

        # (Cout, 9*Cin) @ (9*Cin, S) -> (Cout, S): lane-dense output (S on lanes)
        acc = jnp.dot(w_ref[...], t, preferred_element_type=jnp.float32)
        y = (acc + b_ref[...]) * mask              # bias on interior, zero border

        y_ref[...] = y.astype(y_ref.dtype)[None]
        # Fused BN partial statistics (border is zero => sums over interior only).
        sum_ref[...] = jnp.sum(y, axis=1, keepdims=True)[None]
        sq_ref[...] = jnp.sum(y * y, axis=1, keepdims=True)[None]

    return kernel


def conv_bn_layer(x_pf, w2, b, scale_in, shift_in, mask, *, apply_prologue, Wp):
    # x_pf: (B, Cin, S) bf16, w2: (Cout, 9*Cin) bf16, b: (Cout, 1) f32,
    # scale_in/shift_in: (Cin, 1) f32, mask: (1, S) f32.
    B, Cin, S = x_pf.shape
    Cout = w2.shape[0]
    kernel = _make_conv_kernel(apply_prologue, Wp)
    y, psum, psq = pl.pallas_call(
        kernel,
        out_shape=(jax.ShapeDtypeStruct((B, Cout, S), jnp.bfloat16),
                   jax.ShapeDtypeStruct((B, Cout, 1), jnp.float32),
                   jax.ShapeDtypeStruct((B, Cout, 1), jnp.float32)),
        grid=(B,),
        in_specs=[
            pl.BlockSpec((1, Cin, S), lambda bb: (bb, 0, 0)),
            pl.BlockSpec((Cout, 9 * Cin), lambda bb: (0, 0)),
            pl.BlockSpec((Cout, 1), lambda bb: (0, 0)),
            pl.BlockSpec((Cin, 1), lambda bb: (0, 0)),
            pl.BlockSpec((Cin, 1), lambda bb: (0, 0)),
            pl.BlockSpec((1, S), lambda bb: (0, 0)),
        ],
        out_specs=(pl.BlockSpec((1, Cout, S), lambda bb: (bb, 0, 0)),
                   pl.BlockSpec((1, Cout, 1), lambda bb: (bb, 0, 0)),
                   pl.BlockSpec((1, Cout, 1), lambda bb: (bb, 0, 0))),
        compiler_params=pltpu.CompilerParams(
            dimension_semantics=("parallel",),
            vmem_limit_bytes=_VMEM_LIMIT),
    )(x_pf, w2, b, scale_in, shift_in, mask)
    # TODO(synk): for large images on v7x (64 MiB VMEM), add an H-strip grid
    # axis (also "parallel") instead of whole-image-per-batch blocks.
    return y, psum, psq


# ----------------------------------------------------------------------------
# Kernel 3: final BN + ReLU epilogue (lane-dense elementwise on (Cout, S)).
# ----------------------------------------------------------------------------
def _bn_relu_epilogue_kernel(y_ref, scale_ref, shift_ref, o_ref):
    y = y_ref[0].astype(jnp.float32)               # (C, S)
    o_ref[...] = jnp.maximum(y * scale_ref[...] + shift_ref[...], 0.0)[None]


def bn_relu_epilogue(y, scale, shift):
    B, C, S = y.shape
    return pl.pallas_call(
        _bn_relu_epilogue_kernel,
        out_shape=jax.ShapeDtypeStruct((B, C, S), jnp.float32),
        grid=(B,),
        in_specs=[pl.BlockSpec((1, C, S), lambda bb: (bb, 0, 0)),
                  pl.BlockSpec((C, 1), lambda bb: (0, 0)),
                  pl.BlockSpec((C, 1), lambda bb: (0, 0))],
        out_specs=pl.BlockSpec((1, C, S), lambda bb: (bb, 0, 0)),
        compiler_params=pltpu.CompilerParams(
            dimension_semantics=("parallel",),
            vmem_limit_bytes=_VMEM_LIMIT),
    )(y, scale.reshape(C, 1), shift.reshape(C, 1))


# ----------------------------------------------------------------------------
# JAX glue: bilinear upsample (align_corners=True), F.pad, concat, params,
# BN statistic finalization, and the full Up forward.
# ----------------------------------------------------------------------------
def bilinear_upsample_matrix(n_in, n_out):
    # Exact nn.Upsample(scale_factor=2, mode='bilinear', align_corners=True)
    # 1-D interpolation matrix: out = A @ in.
    if n_in == 1:
        return jnp.ones((n_out, 1), jnp.float32)
    i = jnp.arange(n_out, dtype=jnp.float32)
    src = i * (n_in - 1) / (n_out - 1)
    lo = jnp.clip(jnp.floor(src).astype(jnp.int32), 0, n_in - 2)
    frac = src - lo.astype(jnp.float32)
    rows = jnp.arange(n_out)
    A = jnp.zeros((n_out, n_in), jnp.float32)
    A = A.at[rows, lo].add(1.0 - frac)
    A = A.at[rows, lo + 1].add(frac)
    return A


def init_up_params(key, in_channels, out_channels):
    mid = in_channels // 2
    k1, k2 = jax.random.split(key, 2)

    def conv_init(k, cin, cout):
        kw, kb = jax.random.split(k)
        bound = 1.0 / jnp.sqrt(float(cin * 9))
        w = jax.random.uniform(kw, (cout, cin, 3, 3), jnp.float32, -bound, bound)
        b = jax.random.uniform(kb, (cout,), jnp.float32, -bound, bound)
        return w, b

    w1, b1 = conv_init(k1, in_channels, mid)
    w2, b2 = conv_init(k2, mid, out_channels)
    return dict(
        w1=w1, b1=b1, g1=jnp.ones((mid,), jnp.float32),
        be1=jnp.zeros((mid,), jnp.float32),
        w2=w2, b2=b2, g2=jnp.ones((out_channels,), jnp.float32),
        be2=jnp.zeros((out_channels,), jnp.float32),
    )


def _prep_weight(w):
    # (Cout, Cin, 3, 3) -> (Cout, 9*Cin) bf16, column index = (kh*3+kw)*Cin + ci
    cout, cin = w.shape[0], w.shape[1]
    return jnp.transpose(w, (0, 2, 3, 1)).reshape(cout, 9 * cin).astype(jnp.bfloat16)


def up_forward(x1, x2, params):
    # x1: (B, C1, H1, W1), x2: (B, C2, 2*H1, 2*W1), NCHW float32,
    # with C1 + C2 == in_channels of the Up module.
    B, C1, H1, W1 = x1.shape

    # Bilinear upsample (align_corners=True) via separable interp matrices (XLA).
    Ah = bilinear_upsample_matrix(H1, 2 * H1)
    Aw = bilinear_upsample_matrix(W1, 2 * W1)
    x1u = jnp.einsum('ip,jq,bcpq->bcij', Ah, Aw, x1)

    # F.pad to x2's spatial size (same split as the PyTorch code), then concat.
    diffY = x2.shape[2] - x1u.shape[2]
    diffX = x2.shape[3] - x1u.shape[3]
    x1u = jnp.pad(x1u, ((0, 0), (0, 0),
                        (diffY // 2, diffY - diffY // 2),
                        (diffX // 2, diffX - diffX // 2)))
    x = jnp.concatenate([x2, x1u], axis=1)        # (B, Cin, H, W)

    B_, Cin, H, W = x.shape
    Hp, Wp = H + 2, W + 2
    S = Hp * Wp

    # One-time embed into the zero-bordered padded flat layout (conv halo),
    # cast to bf16.  No further per-conv padding round trips.
    xpf = jnp.zeros((B_, Cin, Hp, Wp), jnp.bfloat16)
    xpf = xpf.at[:, :, 1:-1, 1:-1].set(x.astype(jnp.bfloat16))
    xpf = xpf.reshape(B_, Cin, S)

    # Interior mask in the padded flat layout.
    rows = jnp.arange(Hp)[:, None]
    cols = jnp.arange(Wp)[None, :]
    mask = ((rows >= 1) & (rows <= H) & (cols >= 1) & (cols <= W))
    mask = mask.astype(jnp.float32).reshape(1, S)

    n = float(B_ * H * W)

    def finalize_stats(psum, psq, gamma, beta):
        s = jnp.sum(psum[:, :, 0], axis=0)
        sq = jnp.sum(psq[:, :, 0], axis=0)
        mean = s / n
        var = jnp.maximum(sq / n - mean * mean, 0.0)   # clamp (rounding safety)
        scale = gamma / jnp.sqrt(var + _EPS)
        shift = beta - mean * scale
        return scale, shift

    mid = params['w1'].shape[0]
    cout = params['w2'].shape[0]

    # Layer 1: conv + bias, fused BN partial stats.
    y1, s1, q1 = conv_bn_layer(
        xpf, _prep_weight(params['w1']), params['b1'].reshape(mid, 1),
        jnp.ones((Cin, 1), jnp.float32), jnp.zeros((Cin, 1), jnp.float32), mask,
        apply_prologue=False, Wp=Wp)
    scale1, shift1 = finalize_stats(s1, q1, params['g1'], params['be1'])

    # Layer 2: BN+ReLU of layer 1 fused as input prologue + conv + bias + stats.
    y2, s2, q2 = conv_bn_layer(
        y1, _prep_weight(params['w2']), params['b2'].reshape(cout, 1),
        scale1.reshape(mid, 1), shift1.reshape(mid, 1), mask,
        apply_prologue=True, Wp=Wp)
    scale2, shift2 = finalize_stats(s2, q2, params['g2'], params['be2'])

    # Final BN + ReLU epilogue (lane-dense), then un-pad back to NCHW.
    out = bn_relu_epilogue(y2, scale2, shift2)
    out = out.reshape(B_, cout, Hp, Wp)[:, :, 1:-1, 1:-1]
    return out


if __name__ == "__main__":
    key = jax.random.PRNGKey(0)
    kp, kx1, kx2 = jax.random.split(key, 3)

    in_channels, out_channels = 8, 4       # Up(8, 4, bilinear=True), mid = 4
    B, H, W = 2, 16, 16

    params = init_up_params(kp, in_channels, out_channels)
    # x1 comes from a deeper (coarser) level: half spatial, in_channels//2 chans.
    x1 = jax.random.normal(kx1, (B, in_channels // 2, H // 2, W // 2), jnp.float32)
    x2 = jax.random.normal(kx2, (B, in_channels // 2, H, W), jnp.float32)

    out = jax.jit(up_forward)(x1, x2, params)
    out = jax.block_until_ready(out)
    assert out.shape == (B, out_channels, H, W), out.shape
    assert bool(jnp.all(jnp.isfinite(out)))
    print("KERNEL_OK")
</pallas_src>

<mosaic_0001>
module attributes {stable_mosaic.version = 11 : i64} {
  func.func @kernel(%arg0: i32, %arg1: memref<1x8x324xbf16, #tpu.memory_space<vmem>>, %arg2: memref<4x72xbf16, #tpu.memory_space<vmem>>, %arg3: memref<4x1xf32, #tpu.memory_space<vmem>>, %arg4: memref<8x1xf32, #tpu.memory_space<vmem>>, %arg5: memref<8x1xf32, #tpu.memory_space<vmem>>, %arg6: memref<1x324xf32, #tpu.memory_space<vmem>>, %arg7: memref<1x4x324xbf16, #tpu.memory_space<vmem>>, %arg8: memref<1x4x1xf32, #tpu.memory_space<vmem>>, %arg9: memref<1x4x1xf32, #tpu.memory_space<vmem>>) attributes {dimension_semantics = [#tpu.dimension_semantics<parallel>], iteration_bounds = array<i64: 2>, scalar_prefetch = 0 : i64, scratch_operands = 0 : i64, tpu.core_type = #tpu.core_type<tc>, window_params = [{transform_indices = @transform_0, window_bounds = array<i64: 1, 8, 324>}, {pipeline_mode = #tpu.pipeline_mode<synchronous>, transform_indices = @transform_1, window_bounds = array<i64: 4, 72>}, {pipeline_mode = #tpu.pipeline_mode<synchronous>, transform_indices = @transform_2, window_bounds = array<i64: 4, 1>}, {pipeline_mode = #tpu.pipeline_mode<synchronous>, transform_indices = @transform_3, window_bounds = array<i64: 8, 1>}, {pipeline_mode = #tpu.pipeline_mode<synchronous>, transform_indices = @transform_4, window_bounds = array<i64: 8, 1>}, {pipeline_mode = #tpu.pipeline_mode<synchronous>, transform_indices = @transform_5, window_bounds = array<i64: 1, 324>}, {transform_indices = @transform_6, window_bounds = array<i64: 1, 4, 324>}, {transform_indices = @transform_7, window_bounds = array<i64: 1, 4, 1>}, {transform_indices = @transform_8, window_bounds = array<i64: 1, 4, 1>}]} {
    %c0 = arith.constant 0 : index
    %c0_0 = arith.constant 0 : index
    %0 = vector.load %arg6[%c0, %c0_0] : memref<1x324xf32, #tpu.memory_space<vmem>>, vector<1x324xf32>
    %c0_1 = arith.constant 0 : index
    %c0_2 = arith.constant 0 : index
    %c0_3 = arith.constant 0 : index
    %1 = vector.load %arg1[%c0_1, %c0_2, %c0_3] : memref<1x8x324xbf16, #tpu.memory_space<vmem>>, vector<1x8x324xbf16>
    %2 = vector.shape_cast %1 : vector<1x8x324xbf16> to vector<8x324xbf16>
    %cst = arith.constant 0.000000e+00 : bf16
    %3 = vector.broadcast %cst : bf16 to vector<8x19xbf16>
    %4 = tpu.concatenate %3, %2, %3 in 1 : vector<8x19xbf16>, vector<8x324xbf16>, vector<8x19xbf16> -> vector<8x362xbf16>
    %5 = vector.extract_strided_slice %4 {offsets = [0, 0], sizes = [8, 324], strides = [1, 1]} : vector<8x362xbf16> to vector<8x324xbf16>
    %6 = vector.extract_strided_slice %4 {offsets = [0, 1], sizes = [8, 324], strides = [1, 1]} : vector<8x362xbf16> to vector<8x324xbf16>
    %7 = vector.extract_strided_slice %4 {offsets = [0, 2], sizes = [8, 324], strides = [1, 1]} : vector<8x362xbf16> to vector<8x324xbf16>
    %8 = vector.extract_strided_slice %4 {offsets = [0, 18], sizes = [8, 324], strides = [1, 1]} : vector<8x362xbf16> to vector<8x324xbf16>
    %9 = vector.extract_strided_slice %4 {offsets = [0, 19], sizes = [8, 324], strides = [1, 1]} : vector<8x362xbf16> to vector<8x324xbf16>
    %10 = vector.extract_strided_slice %4 {offsets = [0, 20], sizes = [8, 324], strides = [1, 1]} : vector<8x362xbf16> to vector<8x324xbf16>
    %11 = vector.extract_strided_slice %4 {offsets = [0, 36], sizes = [8, 324], strides = [1, 1]} : vector<8x362xbf16> to vector<8x324xbf16>
    %12 = vector.extract_strided_slice %4 {offsets = [0, 37], sizes = [8, 324], strides = [1, 1]} : vector<8x362xbf16> to vector<8x324xbf16>
    %13 = vector.extract_strided_slice %4 {offsets = [0, 38], sizes = [8, 324], strides = [1, 1]} : vector<8x362xbf16> to vector<8x324xbf16>
    %14 = tpu.concatenate %5, %6, %7, %8, %9, %10, %11, %12, %13 in 0 : vector<8x324xbf16>, vector<8x324xbf16>, vector<8x324xbf16>, vector<8x324xbf16>, vector<8x324xbf16>, vector<8x324xbf16>, vector<8x324xbf16>, vector<8x324xbf16>, vector<8x324xbf16> -> vector<72x324xbf16>
    %c0_4 = arith.constant 0 : index
    %c0_5 = arith.constant 0 : index
    %15 = vector.load %arg2[%c0_4, %c0_5] : memref<4x72xbf16, #tpu.memory_space<vmem>>, vector<4x72xbf16>
    %cst_6 = arith.constant dense<0.000000e+00> : vector<4x324xf32>
    %16 = tpu.matmul %15, %14, %cst_6 {dimension_numbers = #tpu.dot_dimension_numbers<[1], [0], [0], [1], [0, 0, 1, 1], [], []>} : vector<4x72xbf16>, vector<72x324xbf16>, vector<4x324xf32> -> vector<4x324xf32>
    %c0_7 = arith.constant 0 : index
    %c0_8 = arith.constant 0 : index
    %17 = vector.load %arg3[%c0_7, %c0_8] : memref<4x1xf32, #tpu.memory_space<vmem>>, vector<4x1xf32>
    %18 = vector.broadcast %17 : vector<4x1xf32> to vector<4x324xf32>
    %19 = arith.addf %16, %18 : vector<4x324xf32>
    %20 = vector.broadcast %0 : vector<1x324xf32> to vector<4x324xf32>
    %21 = arith.mulf %19, %20 : vector<4x324xf32>
    %22 = arith.truncf %21 : vector<4x324xf32> to vector<4x324xbf16>
    %23 = vector.shape_cast %22 : vector<4x324xbf16> to vector<1x4x324xbf16>
    %c0_9 = arith.constant 0 : index
    %c0_10 = arith.constant 0 : index
    %c0_11 = arith.constant 0 : index
    %24 = vector.load %arg7[%c0_9, %c0_10, %c0_11] : memref<1x4x324xbf16, #tpu.memory_space<vmem>>, vector<1x4x324xbf16>
    tpu.vector_store %arg7[%c0_9, %c0_10, %c0_11], %23 {strides = array<i32>} : memref<1x4x324xbf16, #tpu.memory_space<vmem>>, vector<1x4x324xbf16>,
    %cst_12 = arith.constant dense<0.000000e+00> : vector<4xf32>
    %25 = vector.multi_reduction <add>, %21, %cst_12 [1] : vector<4x324xf32> to vector<4xf32>
    %26 = vector.shape_cast %25 : vector<4xf32> to vector<4x1xf32>
    %27 = vector.shape_cast %26 : vector<4x1xf32> to vector<1x4x1xf32>
    %c0_13 = arith.constant 0 : index
    %c0_14 = arith.constant 0 : index
    %c0_15 = arith.constant 0 : index
    %28 = vector.load %arg8[%c0_13, %c0_14, %c0_15] : memref<1x4x1xf32, #tpu.memory_space<vmem>>, vector<1x4x1xf32>
    tpu.vector_store %arg8[%c0_13, %c0_14, %c0_15], %27 {strides = array<i32>} : memref<1x4x1xf32, #tpu.memory_space<vmem>>, vector<1x4x1xf32>,
    %29 = arith.mulf %21, %21 : vector<4x324xf32>
    %cst_16 = arith.constant dense<0.000000e+00> : vector<4xf32>
    %30 = vector.multi_reduction <add>, %29, %cst_16 [1] : vector<4x324xf32> to vector<4xf32>
    %31 = vector.shape_cast %30 : vector<4xf32> to vector<4x1xf32>
    %32 = vector.shape_cast %31 : vector<4x1xf32> to vector<1x4x1xf32>
    %c0_17 = arith.constant 0 : index
    %c0_18 = arith.constant 0 : index
    %c0_19 = arith.constant 0 : index
    %33 = vector.load %arg9[%c0_17, %c0_18, %c0_19] : memref<1x4x1xf32, #tpu.memory_space<vmem>>, vector<1x4x1xf32>
    tpu.vector_store %arg9[%c0_17, %c0_18, %c0_19], %32 {strides = array<i32>} : memref<1x4x1xf32, #tpu.memory_space<vmem>>, vector<1x4x1xf32>,
    return
  }
  func.func @transform_0(%arg0: i32) -> (i32, i32, i32) {
    %c0_i32 = arith.constant 0 : i32
    %c0_i32_0 = arith.constant 0 : i32
    %c0_i32_1 = arith.constant 0 : i32
    return %arg0, %c0_i32, %c0_i32_0 : i32, i32, i32
  }
  func.func @transform_1(%arg0: i32) -> (i32, i32) {
    %c0_i32 = arith.constant 0 : i32
    %c0_i32_0 = arith.constant 0 : i32
    %c0_i32_1 = arith.constant 0 : i32
    return %c0_i32, %c0_i32_0 : i32, i32
  }
  func.func @transform_2(%arg0: i32) -> (i32, i32) {
    %c0_i32 = arith.constant 0 : i32
    %c0_i32_0 = arith.constant 0 : i32
    %c0_i32_1 = arith.constant 0 : i32
    return %c0_i32, %c0_i32_0 : i32, i32
  }
  func.func @transform_3(%arg0: i32) -> (i32, i32) {
    %c0_i32 = arith.constant 0 : i32
    %c0_i32_0 = arith.constant 0 : i32
    %c0_i32_1 = arith.constant 0 : i32
    return %c0_i32, %c0_i32_0 : i32, i32
  }
  func.func @transform_4(%arg0: i32) -> (i32, i32) {
    %c0_i32 = arith.constant 0 : i32
    %c0_i32_0 = arith.constant 0 : i32
    %c0_i32_1 = arith.constant 0 : i32
    return %c0_i32, %c0_i32_0 : i32, i32
  }
  func.func @transform_5(%arg0: i32) -> (i32, i32) {
    %c0_i32 = arith.constant 0 : i32
    %c0_i32_0 = arith.constant 0 : i32
    %c0_i32_1 = arith.constant 0 : i32
    return %c0_i32, %c0_i32_0 : i32, i32
  }
  func.func @transform_6(%arg0: i32) -> (i32, i32, i32) {
    %c0_i32 = arith.constant 0 : i32
    %c0_i32_0 = arith.constant 0 : i32
    %c0_i32_1 = arith.constant 0 : i32
    return %arg0, %c0_i32, %c0_i32_0 : i32, i32, i32
  }
  func.func @transform_7(%arg0: i32) -> (i32, i32, i32) {
    %c0_i32 = arith.constant 0 : i32
    %c0_i32_0 = arith.constant 0 : i32
    %c0_i32_1 = arith.constant 0 : i32
    return %arg0, %c0_i32, %c0_i32_0 : i32, i32, i32
  }
  func.func @transform_8(%arg0: i32) -> (i32, i32, i32) {
    %c0_i32 = arith.constant 0 : i32
    %c0_i32_0 = arith.constant 0 : i32
    %c0_i32_1 = arith.constant 0 : i32
    return %arg0, %c0_i32, %c0_i32_0 : i32, i32, i32
  }
}

module attributes {stable_mosaic.version = 11 : i64} {
  func.func @_bn_relu_epilogue_kernel(%arg0: i32, %arg1: memref<1x4x324xbf16, #tpu.memory_space<vmem>>, %arg2: memref<4x1xf32, #tpu.memory_space<vmem>>, %arg3: memref<4x1xf32, #tpu.memory_space<vmem>>, %arg4: memref<1x4x324xf32, #tpu.memory_space<vmem>>) attributes {dimension_semantics = [#tpu.dimension_semantics<parallel>], iteration_bounds = array<i64: 2>, scalar_prefetch = 0 : i64, scratch_operands = 0 : i64, tpu.core_type = #tpu.core_type<tc>, window_params = [{transform_indices = @transform_0, window_bounds = array<i64: 1, 4, 324>}, {pipeline_mode = #tpu.pipeline_mode<synchronous>, transform_indices = @transform_1, window_bounds = array<i64: 4, 1>}, {pipeline_mode = #tpu.pipeline_mode<synchronous>, transform_indices = @transform_2, window_bounds = array<i64: 4, 1>}, {transform_indices = @transform_3, window_bounds = array<i64: 1, 4, 324>}]} {
    %c0 = arith.constant 0 : index
    %c0_0 = arith.constant 0 : index
    %c0_1 = arith.constant 0 : index
    %0 = vector.load %arg1[%c0, %c0_0, %c0_1] : memref<1x4x324xbf16, #tpu.memory_space<vmem>>, vector<1x4x324xbf16>
    %1 = vector.shape_cast %0 : vector<1x4x324xbf16> to vector<4x324xbf16>
    %2 = arith.extf %1 : vector<4x324xbf16> to vector<4x324xf32>
    %c0_2 = arith.constant 0 : index
    %c0_3 = arith.constant 0 : index
    %3 = vector.load %arg2[%c0_2, %c0_3] : memref<4x1xf32, #tpu.memory_space<vmem>>, vector<4x1xf32>
    %4 = vector.broadcast %3 : vector<4x1xf32> to vector<4x324xf32>
    %5 = arith.mulf %2, %4 : vector<4x324xf32>
    %c0_4 = arith.constant 0 : index
    %c0_5 = arith.constant 0 : index
    %6 = vector.load %arg3[%c0_4, %c0_5] : memref<4x1xf32, #tpu.memory_space<vmem>>, vector<4x1xf32>
    %7 = vector.broadcast %6 : vector<4x1xf32> to vector<4x324xf32>
    %8 = arith.addf %5, %7 : vector<4x324xf32>
    %cst = arith.constant 0.000000e+00 : f32
    %9 = vector.broadcast %cst : f32 to vector<4x324xf32>
    %10 = arith.maximumf %8, %9 : vector<4x324xf32>
    %11 = vector.shape_cast %10 : vector<4x324xf32> to vector<1x4x324xf32>
    %c0_6 = arith.constant 0 : index
    %c0_7 = arith.constant 0 : index
    %c0_8 = arith.constant 0 : index
    %12 = vector.load %arg4[%c0_6, %c0_7, %c0_8] : memref<1x4x324xf32, #tpu.memory_space<vmem>>, vector<1x4x324xf32>
    tpu.vector_store %arg4[%c0_6, %c0_7, %c0_8], %11 {strides = array<i32>} : memref<1x4x324xf32, #tpu.memory_space<vmem>>, vector<1x4x324xf32>,
    return
  }
  func.func @transform_0(%arg0: i32) -> (i32, i32, i32) {
    %c0_i32 = arith.constant 0 : i32
    %c0_i32_0 = arith.constant 0 : i32
    %c0_i32_1 = arith.constant 0 : i32
    return %arg0, %c0_i32, %c0_i32_0 : i32, i32, i32
  }
  func.func @transform_1(%arg0: i32) -> (i32, i32) {
    %c0_i32 = arith.constant 0 : i32
    %c0_i32_0 = arith.constant 0 : i32
    %c0_i32_1 = arith.constant 0 : i32
    return %c0_i32, %c0_i32_0 : i32, i32
  }
  func.func @transform_2(%arg0: i32) -> (i32, i32) {
    %c0_i32 = arith.constant 0 : i32
    %c0_i32_0 = arith.constant 0 : i32
    %c0_i32_1 = arith.constant 0 : i32
    return %c0_i32, %c0_i32_0 : i32, i32
  }
  func.func @transform_3(%arg0: i32) -> (i32, i32, i32) {
    %c0_i32 = arith.constant 0 : i32
    %c0_i32_0 = arith.constant 0 : i32
    %c0_i32_1 = arith.constant 0 : i32
    return %arg0, %c0_i32, %c0_i32_0 : i32, i32, i32
  }
}

module attributes {stable_mosaic.version = 11 : i64} {
  func.func @kernel(%arg0: i32, %arg1: memref<1x4x324xbf16, #tpu.memory_space<vmem>>, %arg2: memref<4x36xbf16, #tpu.memory_space<vmem>>, %arg3: memref<4x1xf32, #tpu.memory_space<vmem>>, %arg4: memref<4x1xf32, #tpu.memory_space<vmem>>, %arg5: memref<4x1xf32, #tpu.memory_space<vmem>>, %arg6: memref<1x324xf32, #tpu.memory_space<vmem>>, %arg7: memref<1x4x324xbf16, #tpu.memory_space<vmem>>, %arg8: memref<1x4x1xf32, #tpu.memory_space<vmem>>, %arg9: memref<1x4x1xf32, #tpu.memory_space<vmem>>) attributes {dimension_semantics = [#tpu.dimension_semantics<parallel>], iteration_bounds = array<i64: 2>, scalar_prefetch = 0 : i64, scratch_operands = 0 : i64, tpu.core_type = #tpu.core_type<tc>, window_params = [{transform_indices = @transform_0, window_bounds = array<i64: 1, 4, 324>}, {pipeline_mode = #tpu.pipeline_mode<synchronous>, transform_indices = @transform_1, window_bounds = array<i64: 4, 36>}, {pipeline_mode = #tpu.pipeline_mode<synchronous>, transform_indices = @transform_2, window_bounds = array<i64: 4, 1>}, {pipeline_mode = #tpu.pipeline_mode<synchronous>, transform_indices = @transform_3, window_bounds = array<i64: 4, 1>}, {pipeline_mode = #tpu.pipeline_mode<synchronous>, transform_indices = @transform_4, window_bounds = array<i64: 4, 1>}, {pipeline_mode = #tpu.pipeline_mode<synchronous>, transform_indices = @transform_5, window_bounds = array<i64: 1, 324>}, {transform_indices = @transform_6, window_bounds = array<i64: 1, 4, 324>}, {transform_indices = @transform_7, window_bounds = array<i64: 1, 4, 1>}, {transform_indices = @transform_8, window_bounds = array<i64: 1, 4, 1>}]} {
    %c0 = arith.constant 0 : index
    %c0_0 = arith.constant 0 : index
    %0 = vector.load %arg6[%c0, %c0_0] : memref<1x324xf32, #tpu.memory_space<vmem>>, vector<1x324xf32>
    %c0_1 = arith.constant 0 : index
    %c0_2 = arith.constant 0 : index
    %c0_3 = arith.constant 0 : index
    %1 = vector.load %arg1[%c0_1, %c0_2, %c0_3] : memref<1x4x324xbf16, #tpu.memory_space<vmem>>, vector<1x4x324xbf16>
    %2 = vector.shape_cast %1 : vector<1x4x324xbf16> to vector<4x324xbf16>
    %3 = arith.extf %2 : vector<4x324xbf16> to vector<4x324xf32>
    %c0_4 = arith.constant 0 : index
    %c0_5 = arith.constant 0 : index
    %4 = vector.load %arg4[%c0_4, %c0_5] : memref<4x1xf32, #tpu.memory_space<vmem>>, vector<4x1xf32>
    %5 = vector.broadcast %4 : vector<4x1xf32> to vector<4x324xf32>
    %6 = arith.mulf %3, %5 : vector<4x324xf32>
    %c0_6 = arith.constant 0 : index
    %c0_7 = arith.constant 0 : index
    %7 = vector.load %arg5[%c0_6, %c0_7] : memref<4x1xf32, #tpu.memory_space<vmem>>, vector<4x1xf32>
    %8 = vector.broadcast %7 : vector<4x1xf32> to vector<4x324xf32>
    %9 = arith.addf %6, %8 : vector<4x324xf32>
    %cst = arith.constant 0.000000e+00 : f32
    %10 = vector.broadcast %cst : f32 to vector<4x324xf32>
    %11 = arith.maximumf %9, %10 : vector<4x324xf32>
    %12 = vector.broadcast %0 : vector<1x324xf32> to vector<4x324xf32>
    %13 = arith.mulf %11, %12 : vector<4x324xf32>
    %14 = arith.truncf %13 : vector<4x324xf32> to vector<4x324xbf16>
    %cst_8 = arith.constant 0.000000e+00 : bf16
    %15 = vector.broadcast %cst_8 : bf16 to vector<4x19xbf16>
    %16 = tpu.concatenate %15, %14, %15 in 1 : vector<4x19xbf16>, vector<4x324xbf16>, vector<4x19xbf16> -> vector<4x362xbf16>
    %17 = vector.extract_strided_slice %16 {offsets = [0, 0], sizes = [4, 324], strides = [1, 1]} : vector<4x362xbf16> to vector<4x324xbf16>
    %18 = vector.extract_strided_slice %16 {offsets = [0, 1], sizes = [4, 324], strides = [1, 1]} : vector<4x362xbf16> to vector<4x324xbf16>
    %19 = vector.extract_strided_slice %16 {offsets = [0, 2], sizes = [4, 324], strides = [1, 1]} : vector<4x362xbf16> to vector<4x324xbf16>
    %20 = vector.extract_strided_slice %16 {offsets = [0, 18], sizes = [4, 324], strides = [1, 1]} : vector<4x362xbf16> to vector<4x324xbf16>
    %21 = vector.extract_strided_slice %16 {offsets = [0, 19], sizes = [4, 324], strides = [1, 1]} : vector<4x362xbf16> to vector<4x324xbf16>
    %22 = vector.extract_strided_slice %16 {offsets = [0, 20], sizes = [4, 324], strides = [1, 1]} : vector<4x362xbf16> to vector<4x324xbf16>
    %23 = vector.extract_strided_slice %16 {offsets = [0, 36], sizes = [4, 324], strides = [1, 1]} : vector<4x362xbf16> to vector<4x324xbf16>
    %24 = vector.extract_strided_slice %16 {offsets = [0, 37], sizes = [4, 324], strides = [1, 1]} : vector<4x362xbf16> to vector<4x324xbf16>
    %25 = vector.extract_strided_slice %16 {offsets = [0, 38], sizes = [4, 324], strides = [1, 1]} : vector<4x362xbf16> to vector<4x324xbf16>
    %26 = tpu.concatenate %17, %18, %19, %20, %21, %22, %23, %24, %25 in 0 : vector<4x324xbf16>, vector<4x324xbf16>, vector<4x324xbf16>, vector<4x324xbf16>, vector<4x324xbf16>, vector<4x324xbf16>, vector<4x324xbf16>, vector<4x324xbf16>, vector<4x324xbf16> -> vector<36x324xbf16>
    %c0_9 = arith.constant 0 : index
    %c0_10 = arith.constant 0 : index
    %27 = vector.load %arg2[%c0_9, %c0_10] : memref<4x36xbf16, #tpu.memory_space<vmem>>, vector<4x36xbf16>
    %cst_11 = arith.constant dense<0.000000e+00> : vector<4x324xf32>
    %28 = tpu.matmul %27, %26, %cst_11 {dimension_numbers = #tpu.dot_dimension_numbers<[1], [0], [0], [1], [0, 0, 1, 1], [], []>} : vector<4x36xbf16>, vector<36x324xbf16>, vector<4x324xf32> -> vector<4x324xf32>
    %c0_12 = arith.constant 0 : index
    %c0_13 = arith.constant 0 : index
    %29 = vector.load %arg3[%c0_12, %c0_13] : memref<4x1xf32, #tpu.memory_space<vmem>>, vector<4x1xf32>
    %30 = vector.broadcast %29 : vector<4x1xf32> to vector<4x324xf32>
    %31 = arith.addf %28, %30 : vector<4x324xf32>
    %32 = vector.broadcast %0 : vector<1x324xf32> to vector<4x324xf32>
    %33 = arith.mulf %31, %32 : vector<4x324xf32>
    %34 = arith.truncf %33 : vector<4x324xf32> to vector<4x324xbf16>
    %35 = vector.shape_cast %34 : vector<4x324xbf16> to vector<1x4x324xbf16>
    %c0_14 = arith.constant 0 : index
    %c0_15 = arith.constant 0 : index
    %c0_16 = arith.constant 0 : index
    %36 = vector.load %arg7[%c0_14, %c0_15, %c0_16] : memref<1x4x324xbf16, #tpu.memory_space<vmem>>, vector<1x4x324xbf16>
    tpu.vector_store %arg7[%c0_14, %c0_15, %c0_16], %35 {strides = array<i32>} : memref<1x4x324xbf16, #tpu.memory_space<vmem>>, vector<1x4x324xbf16>,
    %cst_17 = arith.constant dense<0.000000e+00> : vector<4xf32>
    %37 = vector.multi_reduction <add>, %33, %cst_17 [1] : vector<4x324xf32> to vector<4xf32>
    %38 = vector.shape_cast %37 : vector<4xf32> to vector<4x1xf32>
    %39 = vector.shape_cast %38 : vector<4x1xf32> to vector<1x4x1xf32>
    %c0_18 = arith.constant 0 : index
    %c0_19 = arith.constant 0 : index
    %c0_20 = arith.constant 0 : index
    %40 = vector.load %arg8[%c0_18, %c0_19, %c0_20] : memref<1x4x1xf32, #tpu.memory_space<vmem>>, vector<1x4x1xf32>
    tpu.vector_store %arg8[%c0_18, %c0_19, %c0_20], %39 {strides = array<i32>} : memref<1x4x1xf32, #tpu.memory_space<vmem>>, vector<1x4x1xf32>,
    %41 = arith.mulf %33, %33 : vector<4x324xf32>
    %cst_21 = arith.constant dense<0.000000e+00> : vector<4xf32>
    %42 = vector.multi_reduction <add>, %41, %cst_21 [1] : vector<4x324xf32> to vector<4xf32>
    %43 = vector.shape_cast %42 : vector<4xf32> to vector<4x1xf32>
    %44 = vector.shape_cast %43 : vector<4x1xf32> to vector<1x4x1xf32>
    %c0_22 = arith.constant 0 : index
    %c0_23 = arith.constant 0 : index
    %c0_24 = arith.constant 0 : index
    %45 = vector.load %arg9[%c0_22, %c0_23, %c0_24] : memref<1x4x1xf32, #tpu.memory_space<vmem>>, vector<1x4x1xf32>
    tpu.vector_store %arg9[%c0_22, %c0_23, %c0_24], %44 {strides = array<i32>} : memref<1x4x1xf32, #tpu.memory_space<vmem>>, vector<1x4x1xf32>,
    return
  }
  func.func @transform_0(%arg0: i32) -> (i32, i32, i32) {
    %c0_i32 = arith.constant 0 : i32
    %c0_i32_0 = arith.constant 0 : i32
    %c0_i32_1 = arith.constant 0 : i32
    return %arg0, %c0_i32, %c0_i32_0 : i32, i32, i32
  }
  func.func @transform_1(%arg0: i32) -> (i32, i32) {
    %c0_i32 = arith.constant 0 : i32
    %c0_i32_0 = arith.constant 0 : i32
    %c0_i32_1 = arith.constant 0 : i32
    return %c0_i32, %c0_i32_0 : i32, i32
  }
  func.func @transform_2(%arg0: i32) -> (i32, i32) {
    %c0_i32 = arith.constant 0 : i32
    %c0_i32_0 = arith.constant 0 : i32
    %c0_i32_1 = arith.constant 0 : i32
    return %c0_i32, %c0_i32_0 : i32, i32
  }
  func.func @transform_3(%arg0: i32) -> (i32, i32) {
    %c0_i32 = arith.constant 0 : i32
    %c0_i32_0 = arith.constant 0 : i32
    %c0_i32_1 = arith.constant 0 : i32
    return %c0_i32, %c0_i32_0 : i32, i32
  }
  func.func @transform_4(%arg0: i32) -> (i32, i32) {
    %c0_i32 = arith.constant 0 : i32
    %c0_i32_0 = arith.constant 0 : i32
    %c0_i32_1 = arith.constant 0 : i32
    return %c0_i32, %c0_i32_0 : i32, i32
  }
  func.func @transform_5(%arg0: i32) -> (i32, i32) {
    %c0_i32 = arith.constant 0 : i32
    %c0_i32_0 = arith.constant 0 : i32
    %c0_i32_1 = arith.constant 0 : i32
    return %c0_i32, %c0_i32_0 : i32, i32
  }
  func.func @transform_6(%arg0: i32) -> (i32, i32, i32) {
    %c0_i32 = arith.constant 0 : i32
    %c0_i32_0 = arith.constant 0 : i32
    %c0_i32_1 = arith.constant 0 : i32
    return %arg0, %c0_i32, %c0_i32_0 : i32, i32, i32
  }
  func.func @transform_7(%arg0: i32) -> (i32, i32, i32) {
    %c0_i32 = arith.constant 0 : i32
    %c0_i32_0 = arith.constant 0 : i32
    %c0_i32_1 = arith.constant 0 : i32
    return %arg0, %c0_i32, %c0_i32_0 : i32, i32, i32
  }
  func.func @transform_8(%arg0: i32) -> (i32, i32, i32) {
    %c0_i32 = arith.constant 0 : i32
    %c0_i32_0 = arith.constant 0 : i32
    %c0_i32_1 = arith.constant 0 : i32
    return %arg0, %c0_i32, %c0_i32_0 : i32, i32, i32
  }
}

</mosaic_0001>

<bundles_post_ra>
// kernel: up_forward.3
= control target key start
LH: loop header
LB: loop body
LE: loop exit
PB: predicated region body
PF: predicated region fallthrough
CT: control target
= control target key end

     0   :  { %s806_s27 = smov 0   ;;  %s912_s0 = inlined_call_operand.vmem [shape: bf16[2,8,324], index: 0, kind: input, shape index: {}]   ;;  %s913_s1 = inlined_call_operand.vmem [shape: bf16[4,72], index: 1, kind: input, shape index: {}]   ;;  %s914_s2 = inlined_call_operand.vmem [shape: f32[4,1], index: 2, kind: input, shape index: {}]   ;;  %s915_s3 = inlined_call_operand.vmem [shape: f32[8,1], index: 3, kind: input, shape index: {}]   ;;  %s916_s4 = inlined_call_operand.vmem [shape: f32[8,1], index: 4, kind: input, shape index: {}]   ;;  %s917_s5 = inlined_call_operand.vmem [shape: f32[1,324], index: 5, kind: input, shape index: {}]   ;;  %s918_s6 = inlined_call_operand.vmem [shape: bf16[2,4,324], index: 6, kind: output, shape index: {0}]   ;;  %s919_s7 = inlined_call_operand.vmem [shape: f32[2,4,1], index: 7, kind: output, shape index: {1}]   ;;  %s920_s8 = inlined_call_operand.vmem [shape: f32[2,4,1], index: 8, kind: output, shape index: {2}]  }
   0x1 LB: > { %s708_s3 = sadd.s32 4294967295, %s749_s27   ;;  %p712_p0 = scmp.ge.s32.totalorder %s749_s27, 1  ;;  %s749_s27 = sphi %s806_s27, %s19_s27  }
   0x2   : > { %p267_p1 = scmp.lt.s32.totalorder %s749_s27, 3 }
   0x4   : > { %p268_p2 = pnand %p712_p0, %p267_p1 }
   0x5   : > { %p309_p3 = scmp.lt.s32.totalorder (!%p268_p2), %s708_s3, 1  ;;  %s751_s9 = smov (!%p268_p2), 19  }
   0x6   : > { %271 = sbr.rel (%p268_p2) target bundleno = 575 (0x23f), region = 44  ;;  %s752_s10 = smov (!%p268_p2), 90  }
   0x7   : > { %s753_s11 = smov (!%p268_p2), 92   ;;  %s754_s12 = smov (!%p268_p2), 109  }
   0x8   : > { %s755_s13 = smov (!%p268_p2), 126   ;;  %s756_s14 = smov (!%p268_p2), 91  }
   0x9   : > { %s757_s15 = smov (!%p268_p2), 108   ;;  %s758_s16 = smov (!%p268_p2), 110  }
   0xa   : > { %s759_s17 = smov (!%p268_p2), 127  }
   0xb   : > { %s924_s3 = smov (!%p309_p3, %s708_s3), 1  ;;  %vm345_vm0 = vcmask 154624   ;;  %vm352_vm1 = vcmask 711680   ;;  %vm429_vm2 = vcmask 736256   ;;  %vm432_vm3 = vcmask 1043456  }
   0xc   : > { %s722_s4 = smul.u32 12, %s924_s3  ;;  %vm411_vm4 = vcmask 752640   ;;  %vm420_vm5 = vcmask 744448   ;;  %vm393_vm6 = vcmask 891904   ;;  %vm402_vm7 = vcmask 883712   ;;  %s715_s28 = sshll.u32 %s924_s3, 2 }
   0xd   : > { %vm375_vm8 = vcmask 1031168   ;;  %vm384_vm9 = vcmask 900096   ;;  %v480_v49 = vld [vmem:[%s914_s2] sm:$0xf]  ;;  %v760_v50 = vmov 0   ;;  %vm366_vm10 = vcmask 1039360  }
   0xe   : > { %s313_s30 = scalar_lea.vmem %s912_s0, %s722_s4  ;;  %742 = vset.pattern.permute.xlu0 %v760_v50  ;;  %vm486_vm11 = vcmask 588800   ;;  %vm573_vm12 = vcmask 551936   ;;  %vm555_vm13 = vcmask 1041408   ;;  %vm565_vm14 = vcmask 1043458   ;;  %s723_s24 = smul.u32 6, %s924_s3 }
   0xf   : > { %v329_v0 = vld [vmem:[%s313_s30] sm:$0xff]  ;;  %v330_v3 = vld [vmem:[%s313_s30 + $0x8] sm:$0xf]  ;;  %vm567_vm15 = vcmask 553988  }
  0x10   : > { %v334_v1 = vunpack.c.h.b16 %v329_v0  ;;  %v333_v2 = vunpack.c.l.b16 %v329_v0  ;;  %v335_v6 = vunpack.c.l.b16 %v330_v3  ;;  %s318_s4 = scalar_lea.vmem %s918_s6, %s723_s24 }
  0x12   : > { %v337_v4 = vpack.c.b16 %v334_v1, %v334_v1  ;;  %v336_v5 = vpack.c.b16 %v333_v2, %v333_v2  ;;  %v338_v7 = vpack.c.b16 %v335_v6, %v335_v6 }
  0x14   : > { %341 = vrot.lane.b32.xlu0 %v337_v4, %s751_s9  ;;  %339 = vrot.lane.b32.xlu1 %v336_v5, %s751_s9 }
  0x1c   : > { %343 = vrot.lane.b32.xlu0 %v338_v7, %s751_s9  ;;  %s322_s9 = scalar_lea.vmem %s919_s7, %s715_s28 }
  0x86   : > { %v342_v8 = vpop.permute.xlu0 %341  ;;  %v340_v9 = vpop.permute.xlu1 %339 }
  0x87   : > { %v820_v10 = vsel %vm345_vm0, %v340_v9, %v342_v8  ;;  %v822_v11 = vsel %vm345_vm0, 0, %v340_v9 }
  0x88   : > { %423 = vrot.lane.b32.xlu2 %v822_v11, %s752_s10  ;;  %407 = vrot.lane.b32.xlu0 %v820_v10, %s753_s11  ;;  %v357_v15 = vrot.slane %v822_v11, 4  ;;  %v358_v16 = vrot.slane %v820_v10, 4 }
  0x8e   : > { %v344_v12 = vpop.permute.xlu0 %343 }
  0x8f   : > { %v347_v13 = vsel %vm345_vm0, %v342_v8, %v344_v12  ;;  %v479_v8 = vld [vmem:[%s913_s1] sm:$0x3]  ;;  %vm887_vm0 = vmor %vm565_vm14, %vm555_vm13 }
  0x90   : > { %v826_v14 = vsel %vm352_vm1, %v347_v13, 0  ;;  %389 = vrot.lane.b32.xlu0 %v820_v10, %s754_s12  ;;  %425 = vrot.lane.b32.xlu2 %v820_v10, %s752_s10  ;;  %vm559_vm1 = vcmask 1045508  }
  0x91   : > { %427 = vrot.lane.b32.xlu1 %v826_v14, %s752_s10  ;;  %v359_v17 = vrot.slane %v826_v14, 4 }
  0x98   : > { %371 = vrot.lane.b32.xlu0 %v820_v10, %s755_s13  ;;  %405 = vrot.lane.b32.xlu2 %v822_v11, %s753_s11 }
  0x99   : > { %414 = vrot.lane.b32.xlu1 %v357_v15, %s756_s14 }
  0xa0   : > { %409 = vrot.lane.b32.xlu0 %v826_v14, %s753_s11  ;;  %387 = vrot.lane.b32.xlu2 %v822_v11, %s754_s12 }
  0xa1   : > { %396 = vrot.lane.b32.xlu1 %v357_v15, %s757_s15 }
  0xa8   : > { %391 = vrot.lane.b32.xlu0 %v826_v14, %s754_s12  ;;  %369 = vrot.lane.b32.xlu2 %v822_v11, %s755_s13  ;;  %s326_s12 = scalar_lea.vmem %s920_s8, %s715_s28 }
  0xa9   : > { %378 = vrot.lane.b32.xlu1 %v357_v15, %s758_s16 }
  0xb0   : > { %373 = vrot.lane.b32.xlu0 %v826_v14, %s755_s13  ;;  %416 = vrot.lane.b32.xlu2 %v358_v16, %s756_s14 }
  0xb1   : > { %418 = vrot.lane.b32.xlu1 %v359_v17, %s756_s14 }
  0xb8   : > { %364 = vrot.lane.b32.xlu0 %v359_v17, %s759_s17  ;;  %398 = vrot.lane.b32.xlu2 %v358_v16, %s757_s15 }
  0xb9   : > { %400 = vrot.lane.b32.xlu1 %v359_v17, %s757_s15 }
  0xc0   : > { %380 = vrot.lane.b32.xlu2 %v358_v16, %s758_s16  ;;  %483 = vperm.xlu0 %742, %v480_v49  }
  0xc1   : > { %382 = vrot.lane.b32.xlu1 %v359_v17, %s758_s16 }
  0xc8   : > { %362 = vrot.lane.b32.xlu2 %v358_v16, %s759_s17 }
  0xc9   : > { %360 = vrot.lane.b32.xlu1 %v357_v15, %s759_s17 }
  0xe2   : > { %v424_v18 = vpop.permute.xlu2 %423 }
  0xea   : > { %v426_v19 = vpop.permute.xlu2 %425 }
  0xeb   : > { %v430_v20 = vsel %vm429_vm2, %v424_v18, %v426_v19 }
  0xec   : > { %v491_v21 = vsel %vm432_vm3, %v430_v20, 0 }
  0xed   : > { %502 = vmatpush.bf16.msra.mxu0 %v491_v21 }
  0xf2   : > { %v406_v22 = vpop.permute.xlu2 %405 }
  0xfa   : > { %v408_v23 = vpop.permute.xlu0 %407  ;;  %v388_v24 = vpop.permute.xlu2 %387 }
  0xfb   : > { %v412_v34 = vsel %vm411_vm4, %v406_v22, %v408_v23 }
 0x102   : > { %v390_v25 = vpop.permute.xlu0 %389  ;;  %v370_v26 = vpop.permute.xlu2 %369 }
 0x103   : > { %v428_v27 = vpop.permute.xlu1 %427  ;;  %v394_v39 = vsel %vm393_vm6, %v388_v24, %v390_v25 }
 0x104   : > { %v497_v28 = vsel %vm432_vm3, %v428_v27, 0  ;;  %v431_v29 = vsel %vm429_vm2, %v426_v19, %v428_v27  ;;  %vm568_vm2 = vmor %vm567_vm15, %vm887_vm0 }
 0x105   : > { %528 = vmatpush.bf16.msra.mxu2 %v497_v28  ;;  %v494_v30 = vsel %vm432_vm3, %v431_v29, 0 }
 0x106   : > { %515 = vmatpush.bf16.msra.mxu1 %v494_v30 }
 0x10a   : > { %v417_v31 = vpop.permute.xlu2 %416  ;;  %v372_v32 = vpop.permute.xlu0 %371 }
 0x10b   : > { %v415_v33 = vpop.permute.xlu1 %414  ;;  %v376_v45 = vsel %vm375_vm8, %v370_v26, %v372_v32 }
 0x10c   : > { %v421_v35 = vsel %vm420_vm5, %v415_v33, %v417_v31 }
 0x10d   : > { %v469_v36 = vsel %vm432_vm3, %v412_v34, %v421_v35 }
 0x10e   : > { %503 = vmatpush.bf16.msra.mxu0 %v469_v36 }
 0x112   : > { %v399_v37 = vpop.permute.xlu2 %398  ;;  %v410_v41 = vpop.permute.xlu0 %409 }
 0x113   : > { %v397_v38 = vpop.permute.xlu1 %396  ;;  %v413_v52 = vsel %vm411_vm4, %v408_v23, %v410_v41  ;;  %vm578_vm4 = vcmask 3072  }
 0x114   : > { %v403_v40 = vsel %vm402_vm7, %v397_v38, %v399_v37 }
 0x115   : > { %v457_v42 = vsel %vm432_vm3, %v394_v39, %v403_v40 }
 0x116   : > { %504 = vmatpush.bf16.msra.mxu0 %v457_v42 }
 0x11a   : > { %v381_v43 = vpop.permute.xlu2 %380  ;;  %v392_v48 = vpop.permute.xlu0 %391 }
 0x11b   : > { %v379_v44 = vpop.permute.xlu1 %378  ;;  %v395_v58 = vsel %vm393_vm6, %v390_v25, %v392_v48 }
 0x11c   : > { %v385_v46 = vsel %vm384_vm9, %v379_v44, %v381_v43 }
 0x11d   : > { %v445_v47 = vsel %vm432_vm3, %v376_v45, %v385_v46 }
 0x11e   : > { %505 = vmatpush.bf16.msra.mxu0 %v445_v47 }
 0x122   : > { %v374_v56 = vpop.permute.xlu0 %373  ;;  %v363_v3 = vpop.permute.xlu2 %362 }
 0x123   : > { %v419_v51 = vpop.permute.xlu1 %418  ;;  %v377_v0 = vsel %vm375_vm8, %v372_v32, %v374_v56 }
 0x124   : > { %v422_v53 = vsel %vm420_vm5, %v417_v31, %v419_v51  ;;  %v477_v54 = vsel %vm432_vm3, %v410_v41, %v419_v51 }
 0x125   : > { %529 = vmatpush.bf16.msra.mxu2 %v477_v54  ;;  %v473_v55 = vsel %vm432_vm3, %v413_v52, %v422_v53 }
 0x126   : > { %516 = vmatpush.bf16.msra.mxu1 %v473_v55 }
 0x12a   : > { %v365_v62 = vpop.permute.xlu0 %364 }
 0x12b   : > { %v401_v57 = vpop.permute.xlu1 %400  ;;  %v368_v5 = vsel %vm366_vm10, %v363_v3, %v365_v62  ;;  %v441_v6 = vsel %vm432_vm3, %v826_v14, %v365_v62 }
 0x12c   : > { %v404_v59 = vsel %vm402_vm7, %v399_v37, %v401_v57  ;;  %v465_v60 = vsel %vm432_vm3, %v392_v48, %v401_v57  ;;  %v438_v7 = vsel %vm432_vm3, %v820_v10, %v368_v5  ;;  %v328_v10 = vld [vmem:[%s917_s5] sm:$0x7] }
 0x12d   : > { %530 = vmatpush.bf16.msra.mxu2 %v465_v60  ;;  %v461_v61 = vsel %vm432_vm3, %v395_v58, %v404_v59  ;;  %v540_v15 = vperm.slane %v328_v10, 1  ;;  %v539_v19 = vperm.slane %v328_v10, 0  ;;  %v541_v21 = vperm.slane %v328_v10, 2 }
 0x12e   : > { %517 = vmatpush.bf16.msra.mxu1 %v461_v61 }
 0x132   : > { %v484_v14 = vpop.permute.xlu0 %483 }
 0x133   : > { %v383_v63 = vpop.permute.xlu1 %382 }
 0x134   : > { %v386_v1 = vsel %vm384_vm9, %v381_v43, %v383_v63  ;;  %v453_v2 = vsel %vm432_vm3, %v374_v56, %v383_v63 }
 0x135   : > { %531 = vmatpush.bf16.msra.mxu2 %v453_v2  ;;  %v449_v4 = vsel %vm432_vm3, %v377_v0, %v386_v1 }
 0x136   : > { %518 = vmatpush.bf16.msra.mxu1 %v449_v4 }
 0x139   : > { %532 = vmatpush.bf16.msra.mxu2 %v441_v6 }
 0x13a   : > { %519 = vmatpush.bf16.msra.mxu1 %v438_v7 }
 0x13b   : > { %v361_v9 = vpop.permute.xlu1 %360 }
 0x13c   : > { %v367_v12 = vsel %vm366_vm10, %v361_v9, %v363_v3  ;;  %719 = vmatmul.msk.bf16.vlgmr.msra.gmra.mxu2 %vm486_vm11, %v479_v8 }
 0x13d   : > { %718 = vmatmul.msk.bf16.vlgmr.msra.gmra.mxu1 %vm486_vm11, %v479_v8  ;;  %v434_v13 = vsel %vm432_vm3, %v822_v11, %v367_v12 }
 0x13e   : > { %506 = vmatpush.bf16.msra.mxu0 %v434_v13 }
 0x141   : > { %717 = vmatmul.msk.bf16.vlgmr.msra.gmra.mxu0 %vm486_vm11, %v479_v8 }
 0x1ba   : > { %v521_v16 = vpop.f32.mrf.mxu1 }
 0x1bb   : > { %v522_v17 = vadd.f32 %v521_v16, %v484_v14 }
 0x1bd   : > { %v546_v18 = vmul.f32 %v540_v15, %v522_v17 }
 0x1be   : > { %v508_v20 = vpop.f32.mrf.mxu0 }
 0x1bf   : > { %v509_v22 = vadd.f32 %v508_v20, %v484_v14  ;;  %v534_v23 = vpop.f32.mrf.mxu2  ;;  %v581_v24 = vmul.f32 %v546_v18, %v546_v18  ;;  %v571_v26 = vsel %vm432_vm3, %v546_v18, 0.0 }
 0x1c0   : > { %v535_v25 = vadd.f32 %v534_v23, %v484_v14 }
 0x1c1   : > { %v545_v11 = vmul.f32 %v539_v19, %v509_v22  ;;  %v584_v32 = vsel %vm432_vm3, %v581_v24, 0.0 }
 0x1c2   : > { %v547_v27 = vmul.f32 %v541_v21, %v535_v25  ;;  %v523_v28 = vpop.f32.mrf.mxu1 }
 0x1c3   : > { %v548_v29 = vpack.c.bf16 %v546_v18, %v545_v11  ;;  %v570_v30 = vsel %vm432_vm3, %v545_v11, 0.0  ;;  %v580_v31 = vmul.f32 %v545_v11, %v545_v11 }
 0x1c4   : > { %v549_v34 = vpack.c.bf16 %v547_v27, %v547_v27  ;;  %v572_v35 = vadd.f32 %v571_v26, %v570_v30  ;;  %v574_v36 = vsel %vm573_vm12, %v547_v27, 0.0  ;;  %v582_v37 = vmul.f32 %v547_v27, %v547_v27 }
 0x1c5   : > { %v552_v38 = vrot.slane %v548_v29, 2  ;;  %v583_v39 = vsel %vm432_vm3, %v580_v31, 0.0 }
 0x1c6   : > { %v553_v40 = vrot.slane %v549_v34, 4  ;;  %v554_v41 = vrot.slane %v549_v34, 6  ;;  %v510_v42 = vpop.f32.mrf.mxu0  ;;  %v575_v43 = vadd.f32 %v574_v36, %v572_v35  ;;  %v585_v44 = vadd.f32 %v584_v32, %v583_v39 }
 0x1c7   : > { %v558_v45 = vsel %vm555_vm13, %v548_v29, %v552_v38  ;;  %v536_v46 = vpop.f32.mrf.mxu2  ;;  %v586_v47 = vsel %vm573_vm12, %v582_v37, 0.0 }
 0x1c8   : > { %v562_v48 = vsel %vm559_vm1, %v553_v40, %v554_v41  ;;  %576 = vadd.xlane.f32.xlu1 %v575_v43  ;;  %v587_v49 = vadd.f32 %v586_v47, %v585_v44 }
 0x1c9   : > { %v563_v50 = vsel %vm432_vm3, %v558_v45, %v562_v48 }
 0x1ca   : > { %569 = vst.msk [vmem:[%s318_s4] sm:$0x3f] %vm568_vm2, %v563_v50  ;;  %588 = vadd.xlane.f32.xlu2 %v587_v49 }
 0x23b   : > { %v577_v51 = vpop.xlane.xlu1 %576 }
 0x23c   : > { %579 = vst.msk [vmem:[%s322_s9] sm:$0xf] %vm578_vm4, %v577_v51 }
 0x23d   : > { %v589_v52 = vpop.xlane.xlu2 %588 }
 0x23e   : > { %590 = vst.msk [vmem:[%s326_s12] sm:$0xf] %vm578_vm4, %v589_v52 }
 0x23f PF: > { %s19_s27 = sadd.s32 1, %s749_s27  }
 0x240   : > { %p16_p4 = scmp.ge.s32.totalorder %s19_s27, 4  }
 0x242   :  { %18 = sbr.rel (!%p16_p4) target bundleno = 1 (0x1), region = 98 }

// kernel: up_forward.5
= control target key start
LH: loop header
LB: loop body
LE: loop exit
PB: predicated region body
PF: predicated region fallthrough
CT: control target
= control target key end

     0   :  { %s310_s12 = smov 0   ;;  %s333_s0 = inlined_call_operand.vmem [shape: bf16[2,4,324], index: 0, kind: input, shape index: {}]   ;;  %s334_s1 = inlined_call_operand.vmem [shape: f32[4,1], index: 1, kind: input, shape index: {}]   ;;  %s335_s2 = inlined_call_operand.vmem [shape: f32[4,1], index: 2, kind: input, shape index: {}]   ;;  %s336_s3 = inlined_call_operand.vmem [shape: f32[2,4,324], index: 3, kind: output, shape index: {}]  }
   0x1 LB: > { %s258_s13 = sadd.s32 4294967295, %s286_s12   ;;  %p262_p0 = scmp.ge.s32.totalorder %s286_s12, 1  ;;  %s286_s12 = sphi %s310_s12, %s13_s12  }
   0x2   : > { %p137_p1 = scmp.lt.s32.totalorder %s286_s12, 3 }
   0x4   : > { %p138_p2 = pnand %p262_p0, %p137_p1 }
   0x5   : > { %p161_p3 = scmp.lt.s32.totalorder (!%p138_p2), %s258_s13, 1 }
   0x6   : > { %141 = sbr.rel (%p138_p2) target bundleno = 144 (0x90), region = 32 }
   0xb   : > { %v174_v0 = vld [vmem:[%s334_s1] sm:$0xf]  ;;  %v288_v1 = vmov 0   ;;  %s338_s13 = smov (!%p161_p3, %s258_s13), 1  ;;  %v289_v3 = vmov 839922192  }
   0xc   : > { %279 = vset.pattern.permute.xlu0 %v288_v1  ;;  %v186_v2 = vld [vmem:[%s335_s2] sm:$0xf]  ;;  %s267_s18 = smul.u32 6, %s338_s13  ;;  %v180_v4 = vunpack.c.l.s4 %v289_v3  ;;  %vm201_vm0 = vcmask 551936  }
   0xd   : > { %177 = vperm.xlu0 %279, %v174_v0   ;;  %s268_s22 = smul.u32 12, %s338_s13 }
   0xe   : > { %s165_s21 = scalar_lea.vmem %s333_s0, %s267_s18  ;;  %v181_v6 = vunpack.c.0.s8 %v180_v4 }
   0xf   : > { %v171_v7 = vld [vmem:[%s165_s21] sm:$0x3f]  ;;  %s170_s25 = scalar_lea.vmem %s336_s3, %s268_s22 }
  0x10   : > { %v172_v8 = vunpack.c.l.bf16 %v171_v7  ;;  %v173_v9 = vunpack.c.h.bf16 %v171_v7 }
  0x15   : > { %189 = vperm.xlu0 %279, %v186_v2  }
  0x7f   : > { %v178_v5 = vpop.permute.xlu0 %177 }
  0x80   : > { %v182_v10 = vperm.slane %v178_v5, %v181_v6 }
  0x82   : > { %v184_v12 = vmul.f32 %v182_v10, %v172_v8  ;;  %v185_v13 = vmul.f32 %v182_v10, %v173_v9 }
  0x87   : > { %v190_v11 = vpop.permute.xlu0 %189 }
  0x88   : > { %v194_v14 = vperm.slane %v190_v11, %v181_v6 }
  0x8a   : > { %v196_v15 = vadd.f32 %v194_v14, %v184_v12  ;;  %v197_v16 = vadd.f32 %v194_v14, %v185_v13 }
  0x8c   : > { %v198_v17 = vmax.f32 %v196_v15, 0.0  ;;  %v199_v18 = vmax.f32 %v197_v16, 0.0 }
  0x8e   : > { %200 = vst [vmem:[%s170_s25] sm:$0xff] %v198_v17 }
  0x8f   : > { %202 = vst.msk [vmem:[%s170_s25 + $0x8] sm:$0xf] %vm201_vm0, %v199_v18 }
  0x90 PF: > { %s13_s12 = sadd.s32 1, %s286_s12  }
  0x91   : > { %p10_p4 = scmp.ge.s32.totalorder %s13_s12, 4  }
  0x93   :  { %12 = sbr.rel (!%p10_p4) target bundleno = 1 (0x1), region = 62 }

// kernel: up_forward.4
= control target key start
LH: loop header
LB: loop body
LE: loop exit
PB: predicated region body
PF: predicated region fallthrough
CT: control target
= control target key end

     0   :  { %s860_s27 = smov 0   ;;  %s983_s0 = inlined_call_operand.vmem [shape: bf16[2,4,324], index: 0, kind: input, shape index: {}]   ;;  %s984_s1 = inlined_call_operand.vmem [shape: bf16[4,36], index: 1, kind: input, shape index: {}]   ;;  %s985_s2 = inlined_call_operand.vmem [shape: f32[4,1], index: 2, kind: input, shape index: {}]   ;;  %s986_s3 = inlined_call_operand.vmem [shape: f32[4,1], index: 3, kind: input, shape index: {}]   ;;  %s987_s4 = inlined_call_operand.vmem [shape: f32[4,1], index: 4, kind: input, shape index: {}]   ;;  %s988_s5 = inlined_call_operand.vmem [shape: f32[1,324], index: 5, kind: input, shape index: {}]   ;;  %s989_s6 = inlined_call_operand.vmem [shape: bf16[2,4,324], index: 6, kind: output, shape index: {0}]   ;;  %s990_s7 = inlined_call_operand.vmem [shape: f32[2,4,1], index: 7, kind: output, shape index: {1}]   ;;  %s991_s8 = inlined_call_operand.vmem [shape: f32[2,4,1], index: 8, kind: output, shape index: {2}]  }
   0x1 LB: > { %s760_s28 = sadd.s32 4294967295, %s802_s27   ;;  %p764_p0 = scmp.ge.s32.totalorder %s802_s27, 1  ;;  %s802_s27 = sphi %s860_s27, %s19_s27  }
   0x2   : > { %p267_p1 = scmp.lt.s32.totalorder %s802_s27, 3 }
   0x4   : > { %p268_p2 = pnand %p764_p0, %p267_p1 }
   0x5   : > { %p309_p3 = scmp.lt.s32.totalorder (!%p268_p2), %s760_s28, 1  ;;  %s806_s17 = smov (!%p268_p2), 19  }
   0x6   : > { %271 = sbr.rel (%p268_p2) target bundleno = 705 (0x2c1), region = 44  ;;  %s807_s18 = smov (!%p268_p2), 90  }
   0x7   : > { %s808_s19 = smov (!%p268_p2), 109   ;;  %s809_s20 = smov (!%p268_p2), 126  }
   0x8   : > { %s810_s21 = smov (!%p268_p2), 108   ;;  %s811_s22 = smov (!%p268_p2), 92  }
   0x9   : > { %s812_s23 = smov (!%p268_p2), 127   ;;  %s813_s24 = smov (!%p268_p2), 91  }
   0xa   : > { %s814_s25 = smov (!%p268_p2), 110  }
   0xb   : > { %v332_v0 = vld [vmem:[%s986_s3] sm:$0xf]  ;;  %v804_v1 = vmov 0   ;;  %s993_s28 = smov (!%p309_p3, %s760_s28), 1  ;;  %v805_v3 = vmov 839922192  }
   0xc   : > { %794 = vset.pattern.permute.xlu0 %v804_v1  ;;  %795 = vset.pattern.permute.xlu2 %v804_v1  ;;  %v344_v2 = vld [vmem:[%s987_s4] sm:$0xf]  ;;  %s774_s11 = smul.u32 6, %s993_s28  ;;  %v338_v4 = vunpack.c.l.s4 %v805_v3  ;;  %vm366_vm0 = vcmask 1043456   ;;  %vm398_vm1 = vcmask 154624   ;;  %vm405_vm2 = vcmask 711680  }
   0xd   : > { %335 = vperm.xlu0 %794, %v332_v0   ;;  %v885_v7 = vld [vmem:[%s988_s5] sm:$0x7]  ;;  %vm491_vm3 = vcmask 1041408   ;;  %vm488_vm4 = vcmask 736256   ;;  %vm461_vm5 = vcmask 883712   ;;  %vm452_vm6 = vcmask 891904  }
   0xe   : > { %s313_s14 = scalar_lea.vmem %s983_s0, %s774_s11  ;;  %v339_v6 = vunpack.c.0.s8 %v338_v4  ;;  %v360_v9 = vperm.slane %v885_v7, 1  ;;  %v359_v14 = vperm.slane %v885_v7, 0  ;;  %v361_v21 = vperm.slane %v885_v7, 2  ;;  %s318_s13 = scalar_lea.vmem %s989_s6, %s774_s11 }
   0xf   : > { %v329_v8 = vld [vmem:[%s313_s14] sm:$0x3f]  ;;  %vm470_vm7 = vcmask 752640   ;;  %vm479_vm8 = vcmask 744448   ;;  %vm505_vm9 = vcmask 1045504   ;;  %vm419_vm10 = vcmask 1039360  }
  0x10   : > { %v330_v10 = vunpack.c.l.bf16 %v329_v8  ;;  %v331_v11 = vunpack.c.h.bf16 %v329_v8  ;;  %v365_v15 = vrot.slane %v360_v9, 4  ;;  %vm546_vm11 = vcmask 293888   ;;  %s767_s14 = sshll.u32 %s993_s28, 2 }
  0x11   : > { %vm431_vm12 = vcmask 1031168   ;;  %vm443_vm13 = vcmask 900096   ;;  %vm617_vm14 = vcmask 1043458   ;;  %vm611_vm15 = vcmask 1045508   ;;  %s322_s16 = scalar_lea.vmem %s990_s7, %s767_s14 }
  0x12   : > { %v367_v22 = vsel %vm366_vm0, %v359_v14, %v365_v15 }
  0x15   : > { %347 = vperm.xlu0 %794, %v344_v2  }
  0x7f   : > { %v336_v5 = vpop.permute.xlu0 %335 }
  0x80   : > { %v340_v12 = vperm.slane %v336_v5, %v339_v6 }
  0x82   : > { %v342_v16 = vmul.f32 %v340_v12, %v330_v10  ;;  %v343_v17 = vmul.f32 %v340_v12, %v331_v11 }
  0x87   : > { %v348_v13 = vpop.permute.xlu0 %347 }
  0x88   : > { %v352_v18 = vperm.slane %v348_v13, %v339_v6 }
  0x8a   : > { %v354_v19 = vadd.f32 %v352_v18, %v342_v16  ;;  %v355_v20 = vadd.f32 %v352_v18, %v343_v17  ;;  %v540_v18 = vld [vmem:[%s985_s2] sm:$0xf] }
  0x8c   : > { %v356_v23 = vmax.f32 %v354_v19, 0.0  ;;  %v357_v24 = vmax.f32 %v355_v20, 0.0 }
  0x8e   : > { %v369_v25 = vmul.f32 %v367_v22, %v356_v23  ;;  %v370_v26 = vmul.f32 %v361_v21, %v357_v24 }
  0x90   : > { %373 = vst [vmem:[#allocation1] ss:$2 sm:$0xff] %v369_v25 }
  0x91   : > { %375 = vst [vmem:[#allocation1 + $0x10] ss:$2 sm:$0xff] %v370_v26 }
  0x97   : > { %v376_v27 = vld.sshfl [vmem:[#allocation1] sm:$0xff pattern:$0x75316420]  ;;  %v377_v28 = vld.sshfl [vmem:[#allocation1 + $0x8] sm:$0xff pattern:$0x75316420] }
  0x98   : > { %v382_v29 = vpack.c.bf16 %v377_v28, %v376_v27  ;;  %v378_v30 = vld.sshfl [vmem:[#allocation1 + $0x10] sm:$0xff pattern:$0x75316420] }
  0x99   : > { %v383_v35 = vpack.c.bf16 %v378_v30, %v378_v30 }
  0x9a   : > { %v387_v31 = vunpack.c.h.b16 %v382_v29  ;;  %v386_v32 = vunpack.c.l.b16 %v382_v29 }
  0x9b   : > { %v388_v36 = vunpack.c.l.b16 %v383_v35 }
  0x9c   : > { %v390_v33 = vpack.c.b16 %v387_v31, %v387_v31  ;;  %v389_v34 = vpack.c.b16 %v386_v32, %v386_v32 }
  0x9d   : > { %v391_v37 = vpack.c.b16 %v388_v36, %v388_v36 }
  0x9e   : > { %394 = vrot.lane.b32.xlu1 %v390_v33, %s806_s17  ;;  %392 = vrot.lane.b32.xlu2 %v389_v34, %s806_s17 }
  0xa6   : > { %396 = vrot.lane.b32.xlu1 %v391_v37, %s806_s17 }
  0xf8   : > { %v393_v38 = vpop.permute.xlu2 %392 }
  0xf9   : > { %v897_v39 = vsel %vm398_vm1, 0, %v393_v38 }
  0xfa   : > { %482 = vrot.lane.b32.xlu0 %v897_v39, %s807_s18  ;;  %v422_v45 = vrot.slane %v897_v39, 4  ;;  %v410_v46 = vrot.slane %v897_v39, 6  ;;  %v434_v50 = vrot.slane %v897_v39, 2 }
 0x102   : > { %446 = vrot.lane.b32.xlu0 %v897_v39, %s808_s19 }
 0x110   : > { %v395_v40 = vpop.permute.xlu1 %394 }
 0x111   : > { %v901_v41 = vsel %vm398_vm1, %v393_v38, %v395_v40 }
 0x112   : > { %484 = vrot.lane.b32.xlu1 %v901_v41, %s807_s18  ;;  %v411_v47 = vrot.slane %v901_v41, 6  ;;  %v423_v49 = vrot.slane %v901_v41, 4  ;;  %v435_v51 = vrot.slane %v901_v41, 2 }
 0x118   : > { %v397_v42 = vpop.permute.xlu1 %396 }
 0x119   : > { %v400_v43 = vsel %vm398_vm1, %v395_v40, %v397_v42  ;;  %vm619_vm1 = vcmask 553988  }
 0x11a   : > { %v904_v44 = vsel %vm405_vm2, %v400_v43, 0  ;;  %448 = vrot.lane.b32.xlu1 %v901_v41, %s808_s19  ;;  %v539_v43 = vld [vmem:[%s984_s1] sm:$0x3]  ;;  %vm625_vm2 = vcmask 551936  }
 0x11b   : > { %486 = vrot.lane.b32.xlu2 %v904_v44, %s807_s18  ;;  %450 = vrot.lane.b32.xlu0 %v904_v44, %s808_s19  ;;  %v412_v48 = vrot.slane %v904_v44, 6  ;;  %v424_v52 = vrot.slane %v904_v44, 4  ;;  %v436_v53 = vrot.slane %v904_v44, 2  ;;  %s326_s19 = scalar_lea.vmem %s991_s8, %s767_s14 }
 0x122   : > { %425 = vrot.lane.b32.xlu1 %v422_v45, %s809_s20 }
 0x123   : > { %455 = vrot.lane.b32.xlu2 %v410_v46, %s810_s21  ;;  %457 = vrot.lane.b32.xlu0 %v411_v47, %s810_s21 }
 0x12a   : > { %459 = vrot.lane.b32.xlu1 %v412_v48, %s810_s21 }
 0x12b   : > { %464 = vrot.lane.b32.xlu2 %v422_v45, %s811_s22  ;;  %466 = vrot.lane.b32.xlu0 %v423_v49, %s811_s22 }
 0x132   : > { %417 = vrot.lane.b32.xlu1 %v412_v48, %s812_s23 }
 0x133   : > { %473 = vrot.lane.b32.xlu2 %v434_v50, %s813_s24  ;;  %475 = vrot.lane.b32.xlu0 %v435_v51, %s813_s24 }
 0x13a   : > { %429 = vrot.lane.b32.xlu1 %v424_v52, %s809_s20 }
 0x13b   : > { %413 = vrot.lane.b32.xlu2 %v410_v46, %s812_s23  ;;  %415 = vrot.lane.b32.xlu0 %v411_v47, %s812_s23 }
 0x142   : > { %441 = vrot.lane.b32.xlu1 %v436_v53, %s814_s25 }
 0x143   : > { %468 = vrot.lane.b32.xlu2 %v424_v52, %s811_s22  ;;  %437 = vrot.lane.b32.xlu0 %v434_v50, %s814_s25 }
 0x14a   : > { %439 = vrot.lane.b32.xlu1 %v435_v51, %s814_s25 }
 0x14b   : > { %477 = vrot.lane.b32.xlu2 %v436_v53, %s813_s24 }
 0x153   : > { %427 = vrot.lane.b32.xlu2 %v423_v49, %s809_s20 }
 0x15b   : > { %543 = vperm.xlu2 %795, %v540_v18  }
 0x16c   : > { %v483_v56 = vpop.permute.xlu0 %482 }
 0x174   : > { %v447_v59 = vpop.permute.xlu0 %446 }
 0x175   : > { %v487_v54 = vpop.permute.xlu2 %486 }
 0x176   : > { %v557_v55 = vsel %vm491_vm3, %v487_v54, 0 }
 0x177   : > { %590 = vmatpush.bf16.msra.mxu2 %v557_v55 }
 0x17d   : > { %v456_v57 = vpop.permute.xlu2 %455 }
 0x184   : > { %v485_v58 = vpop.permute.xlu1 %484 }
 0x185   : > { %v465_v60 = vpop.permute.xlu2 %464  ;;  %v489_v61 = vsel %vm488_vm4, %v483_v56, %v485_v58  ;;  %v490_v62 = vsel %vm488_vm4, %v485_v58, %v487_v54  ;;  %vm618_vm4 = vmor %vm617_vm14, %vm491_vm3 }
 0x186   : > { %v551_v63 = vsel %vm491_vm3, %v489_v61, 0  ;;  %v554_v0 = vsel %vm491_vm3, %v490_v62, 0 }
 0x187   : > { %564 = vmatpush.bf16.msra.mxu0 %v551_v63  ;;  %577 = vmatpush.bf16.msra.mxu1 %v554_v0 }
 0x18c   : > { %v449_v1 = vpop.permute.xlu1 %448 }
 0x18d   : > { %v451_v2 = vpop.permute.xlu0 %450  ;;  %v474_v3 = vpop.permute.xlu2 %473  ;;  %v453_v19 = vsel %vm452_vm6, %v447_v59, %v449_v1 }
 0x18e   : > { %v454_v15 = vsel %vm452_vm6, %v449_v1, %v451_v2  ;;  %vm630_vm6 = vcmask 3072  }
 0x194   : > { %v426_v4 = vpop.permute.xlu1 %425 }
 0x195   : > { %v458_v5 = vpop.permute.xlu0 %457  ;;  %v414_v6 = vpop.permute.xlu2 %413 }
 0x196   : > { %v462_v13 = vsel %vm461_vm5, %v456_v57, %v458_v5 }
 0x197   : > { %v517_v23 = vsel %vm491_vm3, %v453_v19, %v462_v13 }
 0x19c   : > { %v460_v8 = vpop.permute.xlu1 %459 }
 0x19d   : > { %v467_v10 = vpop.permute.xlu0 %466  ;;  %v469_v11 = vpop.permute.xlu2 %468  ;;  %v463_v12 = vsel %vm461_vm5, %v458_v5, %v460_v8  ;;  %v523_v16 = vsel %vm491_vm3, %v451_v2, %v460_v8  ;;  %vm620_vm5 = vmor %vm619_vm1, %vm618_vm4 }
 0x19e   : > { %v471_v17 = vsel %vm470_vm7, %v465_v60, %v467_v10  ;;  %v520_v20 = vsel %vm491_vm3, %v454_v15, %v463_v12  ;;  %v472_v22 = vsel %vm470_vm7, %v467_v10, %v469_v11  ;;  %v529_v25 = vsel %vm366_vm0, %v523_v16, %v469_v11 }
 0x19f   : > { %v525_v28 = vsel %vm366_vm0, %v517_v23, %v471_v17  ;;  %v527_v32 = vsel %vm366_vm0, %v520_v20, %v472_v22 }
 0x1a4   : > { %v418_v24 = vpop.permute.xlu1 %417 }
 0x1a5   : > { %v476_v26 = vpop.permute.xlu0 %475  ;;  %v478_v27 = vpop.permute.xlu2 %477  ;;  %v498_v37 = vsel %vm491_vm3, %v904_v44, %v418_v24 }
 0x1a6   : > { %v480_v29 = vsel %vm479_vm8, %v474_v3, %v476_v26  ;;  %v481_v30 = vsel %vm479_vm8, %v476_v26, %v478_v27  ;;  %v537_v31 = vsel %vm505_vm9, %v529_v25, %v478_v27 }
 0x1a7   : > { %591 = vmatpush.bf16.msra.mxu2 %v537_v31  ;;  %v531_v33 = vsel %vm505_vm9, %v525_v28, %v480_v29  ;;  %v534_v34 = vsel %vm505_vm9, %v527_v32, %v481_v30 }
 0x1a8   : > { %565 = vmatpush.bf16.msra.mxu0 %v531_v33  ;;  %578 = vmatpush.bf16.msra.mxu1 %v534_v34 }
 0x1ac   : > { %v430_v35 = vpop.permute.xlu1 %429 }
 0x1ad   : > { %v416_v36 = vpop.permute.xlu0 %415  ;;  %v504_v38 = vsel %vm366_vm0, %v498_v37, %v430_v35  ;;  %v428_v47 = vpop.permute.xlu2 %427 }
 0x1ae   : > { %v420_v45 = vsel %vm419_vm10, %v414_v6, %v416_v36  ;;  %v421_v46 = vsel %vm419_vm10, %v416_v36, %v418_v24  ;;  %v432_v49 = vsel %vm431_vm12, %v426_v4, %v428_v47  ;;  %v433_v50 = vsel %vm431_vm12, %v428_v47, %v430_v35 }
 0x1af   : > { %v493_v44 = vsel %vm491_vm3, %v897_v39, %v420_v45  ;;  %v496_v48 = vsel %vm491_vm3, %v901_v41, %v421_v46 }
 0x1b0   : > { %v500_v55 = vsel %vm366_vm0, %v493_v44, %v432_v49  ;;  %v502_v56 = vsel %vm366_vm0, %v496_v48, %v433_v50 }
 0x1b4   : > { %v442_v40 = vpop.permute.xlu1 %441 }
 0x1b5   : > { %v513_v42 = vsel %vm505_vm9, %v504_v38, %v442_v40  ;;  %v438_v51 = vpop.permute.xlu0 %437  ;;  %v544_v39 = vpop.permute.xlu2 %543 }
 0x1b6   : > { %592 = vmatpush.bf16.msra.mxu2 %v513_v42 }
 0x1b9   : > { %771 = vmatmul.msk.bf16.vlgmr.msra.gmra.mxu2 %vm546_vm11, %v539_v43 }
 0x1bc   : > { %v440_v52 = vpop.permute.xlu1 %439 }
 0x1bd   : > { %v444_v53 = vsel %vm443_vm13, %v438_v51, %v440_v52  ;;  %v445_v54 = vsel %vm443_vm13, %v440_v52, %v442_v40 }
 0x1be   : > { %v507_v57 = vsel %vm505_vm9, %v500_v55, %v444_v53  ;;  %v510_v58 = vsel %vm505_vm9, %v502_v56, %v445_v54 }
 0x1bf   : > { %566 = vmatpush.bf16.msra.mxu0 %v507_v57  ;;  %579 = vmatpush.bf16.msra.mxu1 %v510_v58 }
 0x1c2   : > { %769 = vmatmul.msk.bf16.vlgmr.msra.gmra.mxu0 %vm546_vm11, %v539_v43  ;;  %770 = vmatmul.msk.bf16.vlgmr.msra.gmra.mxu1 %vm546_vm11, %v539_v43 }
 0x23c   : > { %v594_v41 = vpop.f32.mrf.mxu2 }
 0x23d   : > { %v595_v59 = vadd.f32 %v594_v41, %v544_v39 }
 0x23f   : > { %v568_v60 = vpop.f32.mrf.mxu0  ;;  %v581_v61 = vpop.f32.mrf.mxu1  ;;  %v600_v62 = vmul.f32 %v595_v59, %v361_v21 }
 0x240   : > { %v569_v63 = vadd.f32 %v568_v60, %v544_v39  ;;  %v582_v0 = vadd.f32 %v581_v61, %v544_v39 }
 0x241   : > { %v602_v1 = vpack.c.bf16 %v600_v62, %v600_v62 }
 0x242   : > { %v598_v2 = vmul.f32 %v569_v63, %v359_v14  ;;  %v599_v3 = vmul.f32 %v582_v0, %v360_v9  ;;  %v634_v14 = vmul.f32 %v600_v62, %v600_v62  ;;  %v626_v9 = vsel %vm625_vm2, %v600_v62, 0.0 }
 0x243   : > { %v606_v4 = vrot.slane %v602_v1, 4  ;;  %v607_v5 = vrot.slane %v602_v1, 6 }
 0x244   : > { %v601_v6 = vpack.c.bf16 %v599_v3, %v598_v2  ;;  %v596_v21 = vpop.f32.mrf.mxu2  ;;  %v622_v8 = vsel %vm366_vm0, %v598_v2, 0.0  ;;  %v623_v10 = vsel %vm366_vm0, %v599_v3, 0.0  ;;  %v632_v11 = vmul.f32 %v598_v2, %v598_v2 }
 0x245   : > { %v624_v12 = vadd.f32 %v623_v10, %v622_v8  ;;  %v633_v13 = vmul.f32 %v599_v3, %v599_v3  ;;  %v614_v7 = vsel %vm611_vm15, %v606_v4, %v607_v5  ;;  %v638_v25 = vsel %vm625_vm2, %v634_v14, 0.0 }
 0x246   : > { %v605_v15 = vrot.slane %v601_v6, 2  ;;  %v635_v16 = vsel %vm366_vm0, %v632_v11, 0.0 }
 0x247   : > { %v570_v17 = vpop.f32.mrf.mxu0  ;;  %v583_v18 = vpop.f32.mrf.mxu1  ;;  %v627_v19 = vadd.f32 %v626_v9, %v624_v12  ;;  %v636_v20 = vsel %vm366_vm0, %v633_v13, 0.0 }
 0x248   : > { %v610_v22 = vsel %vm491_vm3, %v601_v6, %v605_v15  ;;  %v637_v23 = vadd.f32 %v636_v20, %v635_v16 }
 0x249   : > { %v615_v24 = vsel %vm366_vm0, %v610_v22, %v614_v7  ;;  %628 = vadd.xlane.f32.xlu0 %v627_v19 }
 0x24a   : > { %621 = vst.msk [vmem:[%s318_s13] sm:$0x3f] %vm620_vm5, %v615_v24  ;;  %v639_v26 = vadd.f32 %v638_v25, %v637_v23 }
 0x24c   : > { %640 = vadd.xlane.f32.xlu1 %v639_v26 }
 0x2bc   : > { %v629_v27 = vpop.xlane.xlu0 %628 }
 0x2bd   : > { %631 = vst.msk [vmem:[%s322_s16] sm:$0xf] %vm630_vm6, %v629_v27 }
 0x2bf   : > { %v641_v28 = vpop.xlane.xlu1 %640 }
 0x2c0   : > { %642 = vst.msk [vmem:[%s326_s19] sm:$0xf] %vm630_vm6, %v641_v28 }
 0x2c1 PF: > { %s19_s27 = sadd.s32 1, %s802_s27  }
 0x2c2   : > { %p16_p4 = scmp.ge.s32.totalorder %s19_s27, 4  }
 0x2c4   :  { %18 = sbr.rel (!%p16_p4) target bundleno = 1 (0x1), region = 99 }

</bundles_post_ra>
